<compile_context>
chip_gen: v7x
topology: tpu7x:2x2x1
jax: 0.10.0
libtpu: 0.0.40
codegen_flags: <defaults>
</compile_context>

<pallas_src>
import functools

import jax
import jax.numpy as jnp
from jax.experimental import pallas as pl
from jax.experimental.pallas import tpu as pltpu

YOLO_V1_OUTPUT = 24   # B*5 + 14 class channels (B = 2)
LANES = 128
_NCORES = 2           # leading "parallel" grid axis (v7x dual-TC; harmless on v5e/v6e)
_MAX_TILE_ROWS = 256  # 24*256*128*4B ~= 3 MiB per input block -> ~12.1 MiB double-buffered
_VMEM_LIMIT = 32 << 20  # explicit scoped-VMEM limit; safe on v5e/v6e/v7x


# --------------------------------- kernel ------------------------------------
def _yolo_loss_kernel(pred_ref, tgt_ref, out_ref, acc_ref, *, l_coord, l_noobj, inv_n):
    step = pl.program_id(1)

    @pl.when(step == 0)
    def _init():
        acc_ref[...] = jnp.zeros_like(acc_ref)

    p = pred_ref[...]          # (24, TILE_R, 128) dense channel planes
    t = tgt_ref[...]

    t_conf = t[4]
    obj = t_conf > 0.0         # cells containing an object
    noobj = t_conf == 0.0      # padded cells carry conf = -1 -> neither mask (load-bearing)

    # --- no-object confidence term (channels 4 and 9) ---
    noo_term = (p[4] - t[4]) ** 2 + (p[9] - t[9]) ** 2

    # --- class term (channels 10..23) ---
    cls_term = jnp.sum((p[10:] - t[10:]) ** 2, axis=0)

    # --- IoU of both predicted boxes against the first target box (hoisted once) ---
    inv14 = 1.0 / 14.0
    tcx = t[0] * inv14
    tcy = t[1] * inv14
    tx1 = tcx - 0.5 * t[2]
    ty1 = tcy - 0.5 * t[3]
    tx2 = tcx + 0.5 * t[2]
    ty2 = tcy + 0.5 * t[3]
    t_area = (tx2 - tx1) * (ty2 - ty1)

    def pred_iou(x, y, w, h):
        cx = x * inv14
        cy = y * inv14
        x1 = cx - 0.5 * w
        y1 = cy - 0.5 * h
        x2 = cx + 0.5 * w
        y2 = cy + 0.5 * h
        iw = jnp.maximum(jnp.minimum(x2, tx2) - jnp.maximum(x1, tx1), 0.0)
        ih = jnp.maximum(jnp.minimum(y2, ty2) - jnp.maximum(y1, ty1), 0.0)
        inter = iw * ih
        area = (x2 - x1) * (y2 - y1)
        denom = area + t_area - inter
        denom = jnp.where(denom != 0.0, denom, 1.0)   # guard 0/0 in dead/padded lanes
        return inter / denom

    iou_a = pred_iou(p[0], p[1], p[2], p[3])
    iou_b = pred_iou(p[5], p[6], p[7], p[8])
    sel_b = iou_b > iou_a                     # first box wins on ties (matches reference)
    max_iou = jnp.maximum(iou_a, iou_b)

    # --- responsible-box selection: only the rows actually consumed ---
    px = jnp.where(sel_b, p[5], p[0])
    py = jnp.where(sel_b, p[6], p[1])
    pw = jnp.where(sel_b, p[7], p[2])
    ph = jnp.where(sel_b, p[8], p[3])
    pc = jnp.where(sel_b, p[9], p[4])
    tx = jnp.where(sel_b, t[5], t[0])
    ty = jnp.where(sel_b, t[6], t[1])
    tw = jnp.where(sel_b, t[7], t[2])
    th = jnp.where(sel_b, t[8], t[3])
    pc_not = jnp.where(sel_b, p[4], p[9])     # non-responsible predicted confidence

    contain = (pc - max_iou) ** 2
    center = (px - tx) ** 2 + (py - ty) ** 2
    hw = (pw - tw) ** 2 + (ph - th) ** 2      # raw w/h (no sqrt), as in the torch module
    not_contain = pc_not ** 2

    # --- single fused per-cell weighted term ---
    obj_term = cls_term + l_coord * (center + hw) + 2.0 * contain + not_contain
    per_cell = (jnp.where(obj, obj_term, 0.0)
                + jnp.where(noobj, l_noobj * noo_term, 0.0))

    # fold TILE_R rows down to one (8, 128) vreg and accumulate across grid steps
    tile_rows = per_cell.shape[0]
    partial = per_cell[0:8]
    for r0 in range(8, tile_rows, 8):
        partial = partial + per_cell[r0:r0 + 8]
    acc_ref[...] += partial

    @pl.when(step == pl.num_programs(1) - 1)
    def _finalize():
        out_ref[...] = jnp.expand_dims(acc_ref[...] * inv_n, 0)


# -------------------------------- wrapper ------------------------------------
def yolo_v1_loss(pred, target, *, S, B, l_coord, l_noobj):
    """pred, target: (N, S, S, 24) channels-last, as in the torch module."""
    N, s1, s2, C = pred.shape
    assert C == YOLO_V1_OUTPUT and B == 2 and s1 == S and s2 == S
    M = N * s1 * s2

    # dense (channels, rows, 128-lanes) packing; TILE_R rows of 128 cells per grid step
    rows_needed = -(-M // LANES)
    tile_r = min(_MAX_TILE_ROWS, max(8, ((rows_needed + 7) // 8) * 8))
    cells_per_tile = tile_r * LANES
    M_pad = -(-M // (_NCORES * cells_per_tile)) * (_NCORES * cells_per_tile)
    R_total = M_pad // LANES
    tiles_per_core = R_total // tile_r // _NCORES

    p2 = jnp.pad(pred.reshape(M, C).astype(jnp.float32), ((0, M_pad - M), (0, 0)))
    # pad target conf with -1 so padded cells are neither "object" (>0) nor "no-object" (==0)
    t2 = jnp.pad(target.reshape(M, C).astype(jnp.float32), ((0, M_pad - M), (0, 0)),
                 constant_values=-1.0)
    # TODO(synk): emit this channels-major layout directly from the upstream detection head so
    # the transpose below fuses with the producer instead of costing an extra HBM round-trip.
    p3 = jnp.transpose(p2).reshape(C, R_total, LANES)
    t3 = jnp.transpose(t2).reshape(C, R_total, LANES)

    kernel = functools.partial(_yolo_loss_kernel, l_coord=float(l_coord),
                               l_noobj=float(l_noobj), inv_n=1.0 / float(N))
    in_map = lambda c, i: (0, c * tiles_per_core + i, 0)
    partials = pl.pallas_call(
        kernel,
        out_shape=jax.ShapeDtypeStruct((_NCORES, 8, LANES), jnp.float32),
        grid_spec=pltpu.PrefetchScalarGridSpec(
            num_scalar_prefetch=0,
            grid=(_NCORES, tiles_per_core),
            in_specs=[pl.BlockSpec((C, tile_r, LANES), in_map),
                      pl.BlockSpec((C, tile_r, LANES), in_map)],
            out_specs=pl.BlockSpec((1, 8, LANES), lambda c, i: (c, 0, 0)),
            scratch_shapes=[pltpu.VMEM((8, LANES), jnp.float32)]),
        compiler_params=pltpu.CompilerParams(
            dimension_semantics=("parallel", "arbitrary"),
            vmem_limit_bytes=_VMEM_LIMIT),
    )(p3, t3)
    # tiny (2, 8, 128) partial-sum tensor; final cross-lane reduce in XLA
    return jnp.sum(partials)


# ------------------------- plain-JAX reference (check) ------------------------
def yolo_v1_loss_ref(pred, target, *, l_coord, l_noobj):
    N = pred.shape[0]
    C = pred.shape[-1]
    p = pred.reshape(-1, C).astype(jnp.float32)
    t = target.reshape(-1, C).astype(jnp.float32)
    obj = t[:, 4] > 0
    noobj = t[:, 4] == 0
    noo = jnp.sum(jnp.where(noobj, (p[:, 4] - t[:, 4]) ** 2 + (p[:, 9] - t[:, 9]) ** 2, 0.0))
    cls = jnp.sum(jnp.where(obj, jnp.sum((p[:, 10:] - t[:, 10:]) ** 2, axis=-1), 0.0))

    def xyxy(b):
        return jnp.stack([b[:, 0] / 14 - 0.5 * b[:, 2], b[:, 1] / 14 - 0.5 * b[:, 3],
                          b[:, 0] / 14 + 0.5 * b[:, 2], b[:, 1] / 14 + 0.5 * b[:, 3]], axis=-1)

    def iou(a, b):
        lt = jnp.maximum(a[:, :2], b[:, :2])
        rb = jnp.minimum(a[:, 2:], b[:, 2:])
        wh = jnp.maximum(rb - lt, 0.0)
        inter = wh[:, 0] * wh[:, 1]
        aa = (a[:, 2] - a[:, 0]) * (a[:, 3] - a[:, 1])
        ab = (b[:, 2] - b[:, 0]) * (b[:, 3] - b[:, 1])
        return inter / (aa + ab - inter)

    pa, pb, ta, tb = p[:, 0:5], p[:, 5:10], t[:, 0:5], t[:, 5:10]
    iou_a = iou(xyxy(pa), xyxy(ta))
    iou_b = iou(xyxy(pb), xyxy(ta))
    sel_b = (iou_b > iou_a)[:, None]
    max_iou = jnp.maximum(iou_a, iou_b)
    pr = jnp.where(sel_b, pb, pa)
    tr = jnp.where(sel_b, tb, ta)
    pn = jnp.where(sel_b, pa, pb)
    contain = jnp.sum(jnp.where(obj, (pr[:, 4] - max_iou) ** 2, 0.0))
    center = jnp.sum(jnp.where(obj, (pr[:, 0] - tr[:, 0]) ** 2 + (pr[:, 1] - tr[:, 1]) ** 2, 0.0))
    hw = jnp.sum(jnp.where(obj, (pr[:, 2] - tr[:, 2]) ** 2 + (pr[:, 3] - tr[:, 3]) ** 2, 0.0))
    not_contain = jnp.sum(jnp.where(obj, pn[:, 4] ** 2, 0.0))
    loc = center + hw
    return (l_coord * loc + 2 * contain + not_contain + l_noobj * noo + cls) / N


if __name__ == "__main__":
    # module hyper-params (deterministic, in-script): S=7 grid, B=2 boxes, standard YOLO weights
    S, B, l_coord, l_noobj = 7, 2, 5.0, 0.5

    def make_inputs(key, N):
        k1, k2, k3, k4 = jax.random.split(key, 4)
        pred = jax.random.uniform(k1, (N, S, S, YOLO_V1_OUTPUT), dtype=jnp.float32)
        obj = jax.random.bernoulli(k2, 0.3, (N, S, S)).astype(jnp.float32)
        box = jax.random.uniform(k3, (N, S, S, 4), dtype=jnp.float32) * 0.5 + 0.25
        cls = jax.random.uniform(k4, (N, S, S, 14), dtype=jnp.float32)
        conf = obj[..., None]
        # target layout per cell: [box(4), conf, box(4), conf, 14 class scores]
        target = jnp.concatenate([box, conf, box, conf, cls * conf], axis=-1)
        return pred, target

    key = jax.random.PRNGKey(0)
    k_small, k_big = jax.random.split(key)

    # small canonical shape (N=2)
    pred, target = make_inputs(k_small, 2)
    loss = yolo_v1_loss(pred, target, S=S, B=B, l_coord=l_coord, l_noobj=l_noobj)
    jax.block_until_ready(loss)
    ref = yolo_v1_loss_ref(pred, target, l_coord=l_coord, l_noobj=l_noobj)
    assert jnp.allclose(loss, ref, rtol=1e-5, atol=1e-5), (float(loss), float(ref))

    # slightly larger batch to exercise multi-row tiling / padding path
    pred2, target2 = make_inputs(k_big, 16)
    loss2 = yolo_v1_loss(pred2, target2, S=S, B=B, l_coord=l_coord, l_noobj=l_noobj)
    jax.block_until_ready(loss2)
    ref2 = yolo_v1_loss_ref(pred2, target2, l_coord=l_coord, l_noobj=l_noobj)
    assert jnp.allclose(loss2, ref2, rtol=1e-5, atol=1e-5), (float(loss2), float(ref2))

    # TODO(synk): pdb.set_trace() and the print() side-effects of the torch forward are debugging
    # artifacts and intentionally not reproduced.
    print("KERNEL_OK")
</pallas_src>

<mosaic_0001>
module attributes {stable_mosaic.version = 11 : i64} {
  func.func @_yolo_loss_kernel(%arg0: i32, %arg1: i32, %arg2: memref<24x8x128xf32, #tpu.memory_space<vmem>>, %arg3: memref<24x8x128xf32, #tpu.memory_space<vmem>>, %arg4: memref<1x8x128xf32, #tpu.memory_space<vmem>>, %arg5: memref<8x128xf32, #tpu.memory_space<vmem>>) attributes {dimension_semantics = [#tpu.dimension_semantics<parallel>, #tpu.dimension_semantics<arbitrary>], iteration_bounds = array<i64: 2, 1>, scalar_prefetch = 0 : i64, scratch_operands = 1 : i64, tpu.core_type = #tpu.core_type<tc>, window_params = [{transform_indices = @transform_0, window_bounds = array<i64: 24, 8, 128>}, {transform_indices = @transform_1, window_bounds = array<i64: 24, 8, 128>}, {transform_indices = @transform_2, window_bounds = array<i64: 1, 8, 128>}]} {
    %c0_i32 = arith.constant 0 : i32
    %0 = arith.cmpi eq, %arg1, %c0_i32 : i32
    %1 = arith.extui %0 : i1 to i32
    %c0_i32_0 = arith.constant 0 : i32
    %2 = arith.cmpi ne, %1, %c0_i32_0 : i32
    scf.if %2 {
      %cst_45 = arith.constant 0.000000e+00 : f32
      %236 = vector.broadcast %cst_45 : f32 to vector<8x128xf32>
      %c0_46 = arith.constant 0 : index
      %c0_47 = arith.constant 0 : index
      %237 = vector.load %arg5[%c0_46, %c0_47] : memref<8x128xf32, #tpu.memory_space<vmem>>, vector<8x128xf32>
      tpu.vector_store %arg5[%c0_46, %c0_47], %236 {strides = array<i32>} : memref<8x128xf32, #tpu.memory_space<vmem>>, vector<8x128xf32>,
    } else {
    }
    %c0 = arith.constant 0 : index
    %c0_1 = arith.constant 0 : index
    %c0_2 = arith.constant 0 : index
    %3 = vector.load %arg2[%c0, %c0_1, %c0_2] : memref<24x8x128xf32, #tpu.memory_space<vmem>>, vector<24x8x128xf32>
    %c0_3 = arith.constant 0 : index
    %c0_4 = arith.constant 0 : index
    %c0_5 = arith.constant 0 : index
    %4 = vector.load %arg3[%c0_3, %c0_4, %c0_5] : memref<24x8x128xf32, #tpu.memory_space<vmem>>, vector<24x8x128xf32>
    %5 = vector.extract_strided_slice %4 {offsets = [4, 0, 0], sizes = [1, 8, 128], strides = [1, 1, 1]} : vector<24x8x128xf32> to vector<1x8x128xf32>
    %6 = vector.shape_cast %5 : vector<1x8x128xf32> to vector<8x128xf32>
    %cst = arith.constant 0.000000e+00 : f32
    %7 = vector.broadcast %cst : f32 to vector<8x128xf32>
    %8 = arith.cmpf ogt, %6, %7 : vector<8x128xf32>
    %cst_6 = arith.constant 0.000000e+00 : f32
    %9 = vector.broadcast %cst_6 : f32 to vector<8x128xf32>
    %10 = arith.cmpf oeq, %6, %9 : vector<8x128xf32>
    %11 = vector.extract_strided_slice %3 {offsets = [4, 0, 0], sizes = [1, 8, 128], strides = [1, 1, 1]} : vector<24x8x128xf32> to vector<1x8x128xf32>
    %12 = vector.shape_cast %11 : vector<1x8x128xf32> to vector<8x128xf32>
    %13 = vector.extract_strided_slice %4 {offsets = [4, 0, 0], sizes = [1, 8, 128], strides = [1, 1, 1]} : vector<24x8x128xf32> to vector<1x8x128xf32>
    %14 = vector.shape_cast %13 : vector<1x8x128xf32> to vector<8x128xf32>
    %15 = arith.subf %12, %14 : vector<8x128xf32>
    %16 = arith.mulf %15, %15 : vector<8x128xf32>
    %17 = vector.extract_strided_slice %3 {offsets = [9, 0, 0], sizes = [1, 8, 128], strides = [1, 1, 1]} : vector<24x8x128xf32> to vector<1x8x128xf32>
    %18 = vector.shape_cast %17 : vector<1x8x128xf32> to vector<8x128xf32>
    %19 = vector.extract_strided_slice %4 {offsets = [9, 0, 0], sizes = [1, 8, 128], strides = [1, 1, 1]} : vector<24x8x128xf32> to vector<1x8x128xf32>
    %20 = vector.shape_cast %19 : vector<1x8x128xf32> to vector<8x128xf32>
    %21 = arith.subf %18, %20 : vector<8x128xf32>
    %22 = arith.mulf %21, %21 : vector<8x128xf32>
    %23 = arith.addf %16, %22 : vector<8x128xf32>
    %24 = vector.extract_strided_slice %3 {offsets = [10, 0, 0], sizes = [14, 8, 128], strides = [1, 1, 1]} : vector<24x8x128xf32> to vector<14x8x128xf32>
    %25 = vector.extract_strided_slice %4 {offsets = [10, 0, 0], sizes = [14, 8, 128], strides = [1, 1, 1]} : vector<24x8x128xf32> to vector<14x8x128xf32>
    %26 = arith.subf %24, %25 : vector<14x8x128xf32>
    %27 = arith.mulf %26, %26 : vector<14x8x128xf32>
    %cst_7 = arith.constant dense<0.000000e+00> : vector<8x128xf32>
    %28 = vector.multi_reduction <add>, %27, %cst_7 [0] : vector<14x8x128xf32> to vector<8x128xf32>
    %29 = vector.extract_strided_slice %4 {offsets = [0, 0, 0], sizes = [1, 8, 128], strides = [1, 1, 1]} : vector<24x8x128xf32> to vector<1x8x128xf32>
    %30 = vector.shape_cast %29 : vector<1x8x128xf32> to vector<8x128xf32>
    %cst_8 = arith.constant 0.0714285746 : f32
    %31 = vector.broadcast %cst_8 : f32 to vector<8x128xf32>
    %32 = arith.mulf %30, %31 : vector<8x128xf32>
    %33 = vector.extract_strided_slice %4 {offsets = [1, 0, 0], sizes = [1, 8, 128], strides = [1, 1, 1]} : vector<24x8x128xf32> to vector<1x8x128xf32>
    %34 = vector.shape_cast %33 : vector<1x8x128xf32> to vector<8x128xf32>
    %cst_9 = arith.constant 0.0714285746 : f32
    %35 = vector.broadcast %cst_9 : f32 to vector<8x128xf32>
    %36 = arith.mulf %34, %35 : vector<8x128xf32>
    %37 = vector.extract_strided_slice %4 {offsets = [2, 0, 0], sizes = [1, 8, 128], strides = [1, 1, 1]} : vector<24x8x128xf32> to vector<1x8x128xf32>
    %38 = vector.shape_cast %37 : vector<1x8x128xf32> to vector<8x128xf32>
    %cst_10 = arith.constant 5.000000e-01 : f32
    %39 = vector.broadcast %cst_10 : f32 to vector<8x128xf32>
    %40 = arith.mulf %39, %38 : vector<8x128xf32>
    %41 = arith.subf %32, %40 : vector<8x128xf32>
    %42 = vector.extract_strided_slice %4 {offsets = [3, 0, 0], sizes = [1, 8, 128], strides = [1, 1, 1]} : vector<24x8x128xf32> to vector<1x8x128xf32>
    %43 = vector.shape_cast %42 : vector<1x8x128xf32> to vector<8x128xf32>
    %cst_11 = arith.constant 5.000000e-01 : f32
    %44 = vector.broadcast %cst_11 : f32 to vector<8x128xf32>
    %45 = arith.mulf %44, %43 : vector<8x128xf32>
    %46 = arith.subf %36, %45 : vector<8x128xf32>
    %47 = vector.extract_strided_slice %4 {offsets = [2, 0, 0], sizes = [1, 8, 128], strides = [1, 1, 1]} : vector<24x8x128xf32> to vector<1x8x128xf32>
    %48 = vector.shape_cast %47 : vector<1x8x128xf32> to vector<8x128xf32>
    %cst_12 = arith.constant 5.000000e-01 : f32
    %49 = vector.broadcast %cst_12 : f32 to vector<8x128xf32>
    %50 = arith.mulf %49, %48 : vector<8x128xf32>
    %51 = arith.addf %32, %50 : vector<8x128xf32>
    %52 = vector.extract_strided_slice %4 {offsets = [3, 0, 0], sizes = [1, 8, 128], strides = [1, 1, 1]} : vector<24x8x128xf32> to vector<1x8x128xf32>
    %53 = vector.shape_cast %52 : vector<1x8x128xf32> to vector<8x128xf32>
    %cst_13 = arith.constant 5.000000e-01 : f32
    %54 = vector.broadcast %cst_13 : f32 to vector<8x128xf32>
    %55 = arith.mulf %54, %53 : vector<8x128xf32>
    %56 = arith.addf %36, %55 : vector<8x128xf32>
    %57 = arith.subf %51, %41 : vector<8x128xf32>
    %58 = arith.subf %56, %46 : vector<8x128xf32>
    %59 = arith.mulf %57, %58 : vector<8x128xf32>
    %60 = vector.extract_strided_slice %3 {offsets = [0, 0, 0], sizes = [1, 8, 128], strides = [1, 1, 1]} : vector<24x8x128xf32> to vector<1x8x128xf32>
    %61 = vector.shape_cast %60 : vector<1x8x128xf32> to vector<8x128xf32>
    %62 = vector.extract_strided_slice %3 {offsets = [1, 0, 0], sizes = [1, 8, 128], strides = [1, 1, 1]} : vector<24x8x128xf32> to vector<1x8x128xf32>
    %63 = vector.shape_cast %62 : vector<1x8x128xf32> to vector<8x128xf32>
    %64 = vector.extract_strided_slice %3 {offsets = [2, 0, 0], sizes = [1, 8, 128], strides = [1, 1, 1]} : vector<24x8x128xf32> to vector<1x8x128xf32>
    %65 = vector.shape_cast %64 : vector<1x8x128xf32> to vector<8x128xf32>
    %66 = vector.extract_strided_slice %3 {offsets = [3, 0, 0], sizes = [1, 8, 128], strides = [1, 1, 1]} : vector<24x8x128xf32> to vector<1x8x128xf32>
    %67 = vector.shape_cast %66 : vector<1x8x128xf32> to vector<8x128xf32>
    %cst_14 = arith.constant 0.0714285746 : f32
    %68 = vector.broadcast %cst_14 : f32 to vector<8x128xf32>
    %69 = arith.mulf %61, %68 : vector<8x128xf32>
    %cst_15 = arith.constant 0.0714285746 : f32
    %70 = vector.broadcast %cst_15 : f32 to vector<8x128xf32>
    %71 = arith.mulf %63, %70 : vector<8x128xf32>
    %cst_16 = arith.constant 5.000000e-01 : f32
    %72 = vector.broadcast %cst_16 : f32 to vector<8x128xf32>
    %73 = arith.mulf %72, %65 : vector<8x128xf32>
    %74 = arith.subf %69, %73 : vector<8x128xf32>
    %cst_17 = arith.constant 5.000000e-01 : f32
    %75 = vector.broadcast %cst_17 : f32 to vector<8x128xf32>
    %76 = arith.mulf %75, %67 : vector<8x128xf32>
    %77 = arith.subf %71, %76 : vector<8x128xf32>
    %cst_18 = arith.constant 5.000000e-01 : f32
    %78 = vector.broadcast %cst_18 : f32 to vector<8x128xf32>
    %79 = arith.mulf %78, %65 : vector<8x128xf32>
    %80 = arith.addf %69, %79 : vector<8x128xf32>
    %cst_19 = arith.constant 5.000000e-01 : f32
    %81 = vector.broadcast %cst_19 : f32 to vector<8x128xf32>
    %82 = arith.mulf %81, %67 : vector<8x128xf32>
    %83 = arith.addf %71, %82 : vector<8x128xf32>
    %84 = arith.minimumf %80, %51 : vector<8x128xf32>
    %85 = arith.maximumf %74, %41 : vector<8x128xf32>
    %86 = arith.subf %84, %85 : vector<8x128xf32>
    %cst_20 = arith.constant 0.000000e+00 : f32
    %87 = vector.broadcast %cst_20 : f32 to vector<8x128xf32>
    %88 = arith.maximumf %86, %87 : vector<8x128xf32>
    %89 = arith.minimumf %83, %56 : vector<8x128xf32>
    %90 = arith.maximumf %77, %46 : vector<8x128xf32>
    %91 = arith.subf %89, %90 : vector<8x128xf32>
    %cst_21 = arith.constant 0.000000e+00 : f32
    %92 = vector.broadcast %cst_21 : f32 to vector<8x128xf32>
    %93 = arith.maximumf %91, %92 : vector<8x128xf32>
    %94 = arith.mulf %88, %93 : vector<8x128xf32>
    %95 = arith.subf %80, %74 : vector<8x128xf32>
    %96 = arith.subf %83, %77 : vector<8x128xf32>
    %97 = arith.mulf %95, %96 : vector<8x128xf32>
    %98 = arith.addf %97, %59 : vector<8x128xf32>
    %99 = arith.subf %98, %94 : vector<8x128xf32>
    %cst_22 = arith.constant 0.000000e+00 : f32
    %100 = vector.broadcast %cst_22 : f32 to vector<8x128xf32>
    %101 = arith.cmpf one, %99, %100 : vector<8x128xf32>
    %cst_23 = arith.constant 1.000000e+00 : f32
    %102 = vector.broadcast %cst_23 : f32 to vector<8x128xf32>
    %103 = arith.select %101, %99, %102 : vector<8x128xi1>, vector<8x128xf32>
    %104 = arith.divf %94, %103 : vector<8x128xf32>
    %105 = vector.extract_strided_slice %3 {offsets = [5, 0, 0], sizes = [1, 8, 128], strides = [1, 1, 1]} : vector<24x8x128xf32> to vector<1x8x128xf32>
    %106 = vector.shape_cast %105 : vector<1x8x128xf32> to vector<8x128xf32>
    %107 = vector.extract_strided_slice %3 {offsets = [6, 0, 0], sizes = [1, 8, 128], strides = [1, 1, 1]} : vector<24x8x128xf32> to vector<1x8x128xf32>
    %108 = vector.shape_cast %107 : vector<1x8x128xf32> to vector<8x128xf32>
    %109 = vector.extract_strided_slice %3 {offsets = [7, 0, 0], sizes = [1, 8, 128], strides = [1, 1, 1]} : vector<24x8x128xf32> to vector<1x8x128xf32>
    %110 = vector.shape_cast %109 : vector<1x8x128xf32> to vector<8x128xf32>
    %111 = vector.extract_strided_slice %3 {offsets = [8, 0, 0], sizes = [1, 8, 128], strides = [1, 1, 1]} : vector<24x8x128xf32> to vector<1x8x128xf32>
    %112 = vector.shape_cast %111 : vector<1x8x128xf32> to vector<8x128xf32>
    %cst_24 = arith.constant 0.0714285746 : f32
    %113 = vector.broadcast %cst_24 : f32 to vector<8x128xf32>
    %114 = arith.mulf %106, %113 : vector<8x128xf32>
    %cst_25 = arith.constant 0.0714285746 : f32
    %115 = vector.broadcast %cst_25 : f32 to vector<8x128xf32>
    %116 = arith.mulf %108, %115 : vector<8x128xf32>
    %cst_26 = arith.constant 5.000000e-01 : f32
    %117 = vector.broadcast %cst_26 : f32 to vector<8x128xf32>
    %118 = arith.mulf %117, %110 : vector<8x128xf32>
    %119 = arith.subf %114, %118 : vector<8x128xf32>
    %cst_27 = arith.constant 5.000000e-01 : f32
    %120 = vector.broadcast %cst_27 : f32 to vector<8x128xf32>
    %121 = arith.mulf %120, %112 : vector<8x128xf32>
    %122 = arith.subf %116, %121 : vector<8x128xf32>
    %cst_28 = arith.constant 5.000000e-01 : f32
    %123 = vector.broadcast %cst_28 : f32 to vector<8x128xf32>
    %124 = arith.mulf %123, %110 : vector<8x128xf32>
    %125 = arith.addf %114, %124 : vector<8x128xf32>
    %cst_29 = arith.constant 5.000000e-01 : f32
    %126 = vector.broadcast %cst_29 : f32 to vector<8x128xf32>
    %127 = arith.mulf %126, %112 : vector<8x128xf32>
    %128 = arith.addf %116, %127 : vector<8x128xf32>
    %129 = arith.minimumf %125, %51 : vector<8x128xf32>
    %130 = arith.maximumf %119, %41 : vector<8x128xf32>
    %131 = arith.subf %129, %130 : vector<8x128xf32>
    %cst_30 = arith.constant 0.000000e+00 : f32
    %132 = vector.broadcast %cst_30 : f32 to vector<8x128xf32>
    %133 = arith.maximumf %131, %132 : vector<8x128xf32>
    %134 = arith.minimumf %128, %56 : vector<8x128xf32>
    %135 = arith.maximumf %122, %46 : vector<8x128xf32>
    %136 = arith.subf %134, %135 : vector<8x128xf32>
    %cst_31 = arith.constant 0.000000e+00 : f32
    %137 = vector.broadcast %cst_31 : f32 to vector<8x128xf32>
    %138 = arith.maximumf %136, %137 : vector<8x128xf32>
    %139 = arith.mulf %133, %138 : vector<8x128xf32>
    %140 = arith.subf %125, %119 : vector<8x128xf32>
    %141 = arith.subf %128, %122 : vector<8x128xf32>
    %142 = arith.mulf %140, %141 : vector<8x128xf32>
    %143 = arith.addf %142, %59 : vector<8x128xf32>
    %144 = arith.subf %143, %139 : vector<8x128xf32>
    %cst_32 = arith.constant 0.000000e+00 : f32
    %145 = vector.broadcast %cst_32 : f32 to vector<8x128xf32>
    %146 = arith.cmpf one, %144, %145 : vector<8x128xf32>
    %cst_33 = arith.constant 1.000000e+00 : f32
    %147 = vector.broadcast %cst_33 : f32 to vector<8x128xf32>
    %148 = arith.select %146, %144, %147 : vector<8x128xi1>, vector<8x128xf32>
    %149 = arith.divf %139, %148 : vector<8x128xf32>
    %150 = arith.cmpf ogt, %149, %104 : vector<8x128xf32>
    %151 = arith.maximumf %104, %149 : vector<8x128xf32>
    %152 = vector.extract_strided_slice %3 {offsets = [5, 0, 0], sizes = [1, 8, 128], strides = [1, 1, 1]} : vector<24x8x128xf32> to vector<1x8x128xf32>
    %153 = vector.shape_cast %152 : vector<1x8x128xf32> to vector<8x128xf32>
    %154 = vector.extract_strided_slice %3 {offsets = [0, 0, 0], sizes = [1, 8, 128], strides = [1, 1, 1]} : vector<24x8x128xf32> to vector<1x8x128xf32>
    %155 = vector.shape_cast %154 : vector<1x8x128xf32> to vector<8x128xf32>
    %156 = arith.select %150, %153, %155 : vector<8x128xi1>, vector<8x128xf32>
    %157 = vector.extract_strided_slice %3 {offsets = [6, 0, 0], sizes = [1, 8, 128], strides = [1, 1, 1]} : vector<24x8x128xf32> to vector<1x8x128xf32>
    %158 = vector.shape_cast %157 : vector<1x8x128xf32> to vector<8x128xf32>
    %159 = vector.extract_strided_slice %3 {offsets = [1, 0, 0], sizes = [1, 8, 128], strides = [1, 1, 1]} : vector<24x8x128xf32> to vector<1x8x128xf32>
    %160 = vector.shape_cast %159 : vector<1x8x128xf32> to vector<8x128xf32>
    %161 = arith.select %150, %158, %160 : vector<8x128xi1>, vector<8x128xf32>
    %162 = vector.extract_strided_slice %3 {offsets = [7, 0, 0], sizes = [1, 8, 128], strides = [1, 1, 1]} : vector<24x8x128xf32> to vector<1x8x128xf32>
    %163 = vector.shape_cast %162 : vector<1x8x128xf32> to vector<8x128xf32>
    %164 = vector.extract_strided_slice %3 {offsets = [2, 0, 0], sizes = [1, 8, 128], strides = [1, 1, 1]} : vector<24x8x128xf32> to vector<1x8x128xf32>
    %165 = vector.shape_cast %164 : vector<1x8x128xf32> to vector<8x128xf32>
    %166 = arith.select %150, %163, %165 : vector<8x128xi1>, vector<8x128xf32>
    %167 = vector.extract_strided_slice %3 {offsets = [8, 0, 0], sizes = [1, 8, 128], strides = [1, 1, 1]} : vector<24x8x128xf32> to vector<1x8x128xf32>
    %168 = vector.shape_cast %167 : vector<1x8x128xf32> to vector<8x128xf32>
    %169 = vector.extract_strided_slice %3 {offsets = [3, 0, 0], sizes = [1, 8, 128], strides = [1, 1, 1]} : vector<24x8x128xf32> to vector<1x8x128xf32>
    %170 = vector.shape_cast %169 : vector<1x8x128xf32> to vector<8x128xf32>
    %171 = arith.select %150, %168, %170 : vector<8x128xi1>, vector<8x128xf32>
    %172 = vector.extract_strided_slice %3 {offsets = [9, 0, 0], sizes = [1, 8, 128], strides = [1, 1, 1]} : vector<24x8x128xf32> to vector<1x8x128xf32>
    %173 = vector.shape_cast %172 : vector<1x8x128xf32> to vector<8x128xf32>
    %174 = vector.extract_strided_slice %3 {offsets = [4, 0, 0], sizes = [1, 8, 128], strides = [1, 1, 1]} : vector<24x8x128xf32> to vector<1x8x128xf32>
    %175 = vector.shape_cast %174 : vector<1x8x128xf32> to vector<8x128xf32>
    %176 = arith.select %150, %173, %175 : vector<8x128xi1>, vector<8x128xf32>
    %177 = vector.extract_strided_slice %4 {offsets = [5, 0, 0], sizes = [1, 8, 128], strides = [1, 1, 1]} : vector<24x8x128xf32> to vector<1x8x128xf32>
    %178 = vector.shape_cast %177 : vector<1x8x128xf32> to vector<8x128xf32>
    %179 = vector.extract_strided_slice %4 {offsets = [0, 0, 0], sizes = [1, 8, 128], strides = [1, 1, 1]} : vector<24x8x128xf32> to vector<1x8x128xf32>
    %180 = vector.shape_cast %179 : vector<1x8x128xf32> to vector<8x128xf32>
    %181 = arith.select %150, %178, %180 : vector<8x128xi1>, vector<8x128xf32>
    %182 = vector.extract_strided_slice %4 {offsets = [6, 0, 0], sizes = [1, 8, 128], strides = [1, 1, 1]} : vector<24x8x128xf32> to vector<1x8x128xf32>
    %183 = vector.shape_cast %182 : vector<1x8x128xf32> to vector<8x128xf32>
    %184 = vector.extract_strided_slice %4 {offsets = [1, 0, 0], sizes = [1, 8, 128], strides = [1, 1, 1]} : vector<24x8x128xf32> to vector<1x8x128xf32>
    %185 = vector.shape_cast %184 : vector<1x8x128xf32> to vector<8x128xf32>
    %186 = arith.select %150, %183, %185 : vector<8x128xi1>, vector<8x128xf32>
    %187 = vector.extract_strided_slice %4 {offsets = [7, 0, 0], sizes = [1, 8, 128], strides = [1, 1, 1]} : vector<24x8x128xf32> to vector<1x8x128xf32>
    %188 = vector.shape_cast %187 : vector<1x8x128xf32> to vector<8x128xf32>
    %189 = vector.extract_strided_slice %4 {offsets = [2, 0, 0], sizes = [1, 8, 128], strides = [1, 1, 1]} : vector<24x8x128xf32> to vector<1x8x128xf32>
    %190 = vector.shape_cast %189 : vector<1x8x128xf32> to vector<8x128xf32>
    %191 = arith.select %150, %188, %190 : vector<8x128xi1>, vector<8x128xf32>
    %192 = vector.extract_strided_slice %4 {offsets = [8, 0, 0], sizes = [1, 8, 128], strides = [1, 1, 1]} : vector<24x8x128xf32> to vector<1x8x128xf32>
    %193 = vector.shape_cast %192 : vector<1x8x128xf32> to vector<8x128xf32>
    %194 = vector.extract_strided_slice %4 {offsets = [3, 0, 0], sizes = [1, 8, 128], strides = [1, 1, 1]} : vector<24x8x128xf32> to vector<1x8x128xf32>
    %195 = vector.shape_cast %194 : vector<1x8x128xf32> to vector<8x128xf32>
    %196 = arith.select %150, %193, %195 : vector<8x128xi1>, vector<8x128xf32>
    %197 = vector.extract_strided_slice %3 {offsets = [4, 0, 0], sizes = [1, 8, 128], strides = [1, 1, 1]} : vector<24x8x128xf32> to vector<1x8x128xf32>
    %198 = vector.shape_cast %197 : vector<1x8x128xf32> to vector<8x128xf32>
    %199 = vector.extract_strided_slice %3 {offsets = [9, 0, 0], sizes = [1, 8, 128], strides = [1, 1, 1]} : vector<24x8x128xf32> to vector<1x8x128xf32>
    %200 = vector.shape_cast %199 : vector<1x8x128xf32> to vector<8x128xf32>
    %201 = arith.select %150, %198, %200 : vector<8x128xi1>, vector<8x128xf32>
    %202 = arith.subf %176, %151 : vector<8x128xf32>
    %203 = arith.mulf %202, %202 : vector<8x128xf32>
    %204 = arith.subf %156, %181 : vector<8x128xf32>
    %205 = arith.mulf %204, %204 : vector<8x128xf32>
    %206 = arith.subf %161, %186 : vector<8x128xf32>
    %207 = arith.mulf %206, %206 : vector<8x128xf32>
    %208 = arith.addf %205, %207 : vector<8x128xf32>
    %209 = arith.subf %166, %191 : vector<8x128xf32>
    %210 = arith.mulf %209, %209 : vector<8x128xf32>
    %211 = arith.subf %171, %196 : vector<8x128xf32>
    %212 = arith.mulf %211, %211 : vector<8x128xf32>
    %213 = arith.addf %210, %212 : vector<8x128xf32>
    %214 = arith.mulf %201, %201 : vector<8x128xf32>
    %215 = arith.addf %208, %213 : vector<8x128xf32>
    %cst_34 = arith.constant 5.000000e+00 : f32
    %216 = vector.broadcast %cst_34 : f32 to vector<8x128xf32>
    %217 = arith.mulf %216, %215 : vector<8x128xf32>
    %218 = arith.addf %28, %217 : vector<8x128xf32>
    %cst_35 = arith.constant 2.000000e+00 : f32
    %219 = vector.broadcast %cst_35 : f32 to vector<8x128xf32>
    %220 = arith.mulf %219, %203 : vector<8x128xf32>
    %221 = arith.addf %218, %220 : vector<8x128xf32>
    %222 = arith.addf %221, %214 : vector<8x128xf32>
    %cst_36 = arith.constant 0.000000e+00 : f32
    %223 = vector.broadcast %cst_36 : f32 to vector<8x128xf32>
    %224 = arith.select %8, %222, %223 : vector<8x128xi1>, vector<8x128xf32>
    %cst_37 = arith.constant 5.000000e-01 : f32
    %225 = vector.broadcast %cst_37 : f32 to vector<8x128xf32>
    %226 = arith.mulf %225, %23 : vector<8x128xf32>
    %cst_38 = arith.constant 0.000000e+00 : f32
    %227 = vector.broadcast %cst_38 : f32 to vector<8x128xf32>
    %228 = arith.select %10, %226, %227 : vector<8x128xi1>, vector<8x128xf32>
    %229 = arith.addf %224, %228 : vector<8x128xf32>
    %c0_39 = arith.constant 0 : index
    %c0_40 = arith.constant 0 : index
    %230 = vector.load %arg5[%c0_39, %c0_40] : memref<8x128xf32, #tpu.memory_space<vmem>>, vector<8x128xf32>
    %231 = arith.addf %230, %229 : vector<8x128xf32>
    %c0_41 = arith.constant 0 : index
    %c0_42 = arith.constant 0 : index
    %232 = vector.load %arg5[%c0_41, %c0_42] : memref<8x128xf32, #tpu.memory_space<vmem>>, vector<8x128xf32>
    tpu.vector_store %arg5[%c0_41, %c0_42], %231 {strides = array<i32>} : memref<8x128xf32, #tpu.memory_space<vmem>>, vector<8x128xf32>,
    %c0_i32_43 = arith.constant 0 : i32
    %233 = arith.cmpi eq, %arg1, %c0_i32_43 : i32
    %234 = arith.extui %233 : i1 to i32
    %c0_i32_44 = arith.constant 0 : i32
    %235 = arith.cmpi ne, %234, %c0_i32_44 : i32
    scf.if %235 {
      %c0_45 = arith.constant 0 : index
      %c0_46 = arith.constant 0 : index
      %236 = vector.load %arg5[%c0_45, %c0_46] : memref<8x128xf32, #tpu.memory_space<vmem>>, vector<8x128xf32>
      %cst_47 = arith.constant 5.000000e-01 : f32
      %237 = vector.broadcast %cst_47 : f32 to vector<8x128xf32>
      %238 = arith.mulf %236, %237 : vector<8x128xf32>
      %239 = vector.shape_cast %238 : vector<8x128xf32> to vector<1x8x128xf32>
      %c0_48 = arith.constant 0 : index
      %c0_49 = arith.constant 0 : index
      %c0_50 = arith.constant 0 : index
      %240 = vector.load %arg4[%c0_48, %c0_49, %c0_50] : memref<1x8x128xf32, #tpu.memory_space<vmem>>, vector<1x8x128xf32>
      tpu.vector_store %arg4[%c0_48, %c0_49, %c0_50], %239 {strides = array<i32>} : memref<1x8x128xf32, #tpu.memory_space<vmem>>, vector<1x8x128xf32>,
    } else {
    }
    return
  }
  func.func @transform_0(%arg0: i32, %arg1: i32) -> (i32, i32, i32) {
    %c1_i32 = arith.constant 1 : i32
    %0 = arith.muli %arg0, %c1_i32 : i32
    %1 = arith.addi %0, %arg1 : i32
    %c0_i32 = arith.constant 0 : i32
    %c0_i32_0 = arith.constant 0 : i32
    %c0_i32_1 = arith.constant 0 : i32
    return %c0_i32, %1, %c0_i32_0 : i32, i32, i32
  }
  func.func @transform_1(%arg0: i32, %arg1: i32) -> (i32, i32, i32) {
    %c1_i32 = arith.constant 1 : i32
    %0 = arith.muli %arg0, %c1_i32 : i32
    %1 = arith.addi %0, %arg1 : i32
    %c0_i32 = arith.constant 0 : i32
    %c0_i32_0 = arith.constant 0 : i32
    %c0_i32_1 = arith.constant 0 : i32
    return %c0_i32, %1, %c0_i32_0 : i32, i32, i32
  }
  func.func @transform_2(%arg0: i32, %arg1: i32) -> (i32, i32, i32) {
    %c0_i32 = arith.constant 0 : i32
    %c0_i32_0 = arith.constant 0 : i32
    %c0_i32_1 = arith.constant 0 : i32
    return %arg0, %c0_i32, %c0_i32_0 : i32, i32, i32
  }
}

</mosaic_0001>

<bundles_post_ra>
// kernel: tpu_custom_call.1
= control target key start
LH: loop header
LB: loop body
LE: loop exit
PB: predicated region body
PF: predicated region fallthrough
CT: control target
= control target key end

     0   :  { %7 = vsyncpa [#allocation4], 0  ;;  %s1177_s0 = inlined_call_operand.hbm [shape: f32[24,16,128], index: 0, kind: input, shape index: {}]   ;;  %s1178_s1 = inlined_call_operand.hbm [shape: f32[24,16,128], index: 1, kind: input, shape index: {}]   ;;  %s1179_s2 = inlined_call_operand.hbm [shape: f32[2,8,128], index: 2, kind: output, shape index: {}]  }
   0x1   :  { %9 = vsyncpa [#allocation4 + $0x1], 0 }
   0x2   :  { %10 = vsyncpa [#allocation7], 0 }
   0x3   :  { %12 = vsyncpa [#allocation7 + $0x1], 0 }
   0x4   :  { %13 = vsyncpa [#allocation5], 0 }
   0x5   :  { %15 = vsyncpa [#allocation5 + $0x1], 0  ;;  %s803_s9 = smov 0   ;;  %s805_s10 = smov 0  }
   0x6   :  { %s807_s11 = smov 0   ;;  %s809_s12 = smov 0  }
   0x7   :  { %s811_s13 = smov 0   ;;  %s813_s14 = smov 0  }
   0x8 LB: > { %s545_s15 = sadd.s32 4294967295, %s780_s14   ;;  %s546_s16 = sadd.s32 4294967294, %s780_s14   ;;  %s780_s14 = sphi %s813_s14, %s21_s14   ;;  %s776_s13 = sphi %s811_s13, %s1198_s13   ;;  %s772_s12 = sphi %s809_s12, %s1197_s12   ;;  %s768_s11 = sphi %s807_s11, %s1196_s11   ;;  %s764_s10 = sphi %s805_s10, %s1195_s10   ;;  %s760_s9 = sphi %s803_s9, %s1194_s9  }
   0x9   : > { %s33_s17 = sadd.s32 1, %s776_s13  ;;  %s42_s18 = sadd.s32 1, %s768_s11 }
   0xa   : > { %p35_p0 = scmp.ge.s32.totalorder %s33_s17, 2  ;;  %p49_p1 = scmp.ne.s32.totalorder %s768_s11, %s764_s10 }
   0xb   : > { %p50_p2 = scmp.eq.s32.totalorder %s780_s14, 0  ;;  %p55_p3 = scmp.ne.s32.totalorder %s764_s10, %s760_s9 }
   0xc   : > { %s1200_s17 = smov (%p35_p0, %s33_s17), 0  ;;  %p56_p5 = scmp.eq.s32.totalorder %s545_s15, 0 }
   0xd   : > { %p844_p4 = por %p50_p2, %p49_p1  ;;  %s39_s20 = ssub.s32 %s776_s13, %s1200_s17 }
   0xe   : > { %p107_p6 = scmp.eq.s32.totalorder %s545_s15, 1  ;;  %p40_p7 = scmp.eq.s32.totalorder %s39_s20, 0 }
   0xf   : > { %p850_p8 = por %p56_p5, %p55_p3  ;;  %p113_p10 = scmp.eq.s32.totalorder %s546_s16, 1 }
  0x10   : > { %p854_p9 = por %p107_p6, %p49_p1  ;;  %p577_p13 = scmp.lt.s32.totalorder %s780_s14, 2 }
  0x11   : > { %s1183_s21 = scalar_select %p850_p8, 1, 0 }
  0x12   : > { %s1184_s22 = scalar_select %p854_p9, 1, 0 }
  0x13   : > { %s859_s23 = scalar_select %p40_p7, %s768_s11, %s42_s18  }
  0x14   : > { %p861_p11 = por %p113_p10, %p55_p3  ;;  %s868_s25 = sand.u32 1, %s768_s11  }
  0x15   : > { %s557_s26 = smul.u32 192, %s868_s25  ;;  %s549_s27 = sshll.u32 %s776_s13, 7 }
  0x16   : > { %s1185_s24 = scalar_select %p861_p11, 1, 0 }
  0x17   : > { %p874_p0 = pnand %p577_p13, %p844_p4  ;;  %s883_s3 = scalar_lea.hbm %s1177_s0, %s549_s27 }
  0x18   : > { %s137_s4 = scalar_lea.vmem [#allocation3], %s557_s26  ;;  %s134_s6 = scalar_lea.sflag [#allocation4], %s868_s25 }
  0x19   : > { %s144_s5 = sshll.u32 %s137_s4, 4  ;;  %s634_s7 = scalar_lea.hbm %s883_s3, 3072  ;;  %s887_s5 = int_to_ptr.vmem [resolvable:$true] %s144_s5 }
  0x1a   : > { %p635_p1 = scmp.ne.s32.totalorder %s883_s3, %s634_s7  ;;  %p636_p2 = pneg %p874_p0 }
  0x1b   : > { %s639_s16 = scalar_lea.hbm %s1177_s0, 6144  ;;  %p640_p5 = scmp.lt.u32.totalorder %s883_s3, %s1177_s0 }
  0x1c   : > { %p637_p3 = pnand %p636_p2, %p635_p1  ;;  %p641_p6 = scmp.lt.u32.totalorder %s639_s16, %s634_s7 }
  0x1d   : > { %p643_p10 = scmp.lt.u32.totalorder %s634_s7, %s883_s3 }
  0x1e   : > { %p638_p4 = pneg %p637_p3  ;;  %p642_p7 = por %p641_p6, %p640_p5 }
  0x20   : > { %p644_p13 = por %p643_p10, %p642_p7 }
  0x22   : > { %p645_p12 = pnand %p644_p13, %p638_p4 }
  0x24   : > { %648 = shalt.err (!%p645_p12)
}
  0x25   : > { %s649_s20 = scalar_lea.vmem %s887_s5, 3072  ;;  %s782_s29 = smov [#allocation3]  }
  0x26   : > { %p650_p1 = scmp.ne.s32.totalorder %s887_s5, %s649_s20  ;;  %s654_s30 = sshll.u32 %s782_s29, 4  ;;  %s655_s30 = int_to_ptr.vmem [resolvable:$false] %s654_s30 }
  0x27   : > { %s656_s4 = scalar_lea.vmem %s655_s30, 6144  ;;  %p657_p9 = scmp.lt.s32.totalorder %s887_s5, %s655_s30 }
  0x28   : > { %p652_p3 = pnand %p650_p1, %p636_p2  ;;  %p658_p5 = scmp.lt.s32.totalorder %s656_s4, %s649_s20 }
  0x2a   : > { %p653_p11 = pneg %p652_p3  ;;  %p659_p6 = por %p658_p5, %p657_p9 }
  0x2c   : > { %p660_p7 = pnand %p659_p6, %p653_p11 }
  0x2e   : > { %663 = shalt.err (!%p660_p7)
}
  0x2f   : > { %s783_s7 = smov 256   ;;  %s784_s8 = smov 128  }
  0x30   : > { %s785_s15 = smov 8   ;;  %p551_p9 = scmp.ge.s32.totalorder %s780_s14, 1 }
  0x31   : > { %569 = dma.hbm_to_vmem [thread:$0]  (!%p874_p0), %s883_s3, 3072, %s887_s5, %s134_s6, %s783_s7, %s784_s8, %s785_s15  }
  0x32   : > { %p173_p11 = scmp.lt.s32.totalorder %s780_s14, 3  ;;  %s931_s20 = scalar_lea.hbm %s1178_s1, %s549_s27 }
  0x33   : > { %s158_s29 = scalar_lea.vmem [#allocation6], %s557_s26  ;;  %s155_s3 = scalar_lea.sflag [#allocation7], %s868_s25 }
  0x34   : > { %p922_p12 = pnand %p551_p9, %p173_p11  ;;  %s165_s30 = sshll.u32 %s158_s29, 4  ;;  %s935_s30 = int_to_ptr.vmem [resolvable:$true] %s165_s30 }
  0x35   : > { %s664_s5 = scalar_lea.hbm %s931_s20, 3072  ;;  %s669_s27 = scalar_lea.hbm %s1178_s1, 6144 }
  0x36   : > { %p665_p4 = scmp.ne.s32.totalorder %s931_s20, %s664_s5  ;;  %p670_p1 = scmp.lt.u32.totalorder %s931_s20, %s1178_s1 }
  0x37   : > { %p671_p3 = scmp.lt.u32.totalorder %s669_s27, %s664_s5  ;;  %p673_p6 = scmp.lt.u32.totalorder %s664_s5, %s931_s20 }
  0x38   : > { %p667_p10 = pnand %p665_p4, %p636_p2 }
  0x39   : > { %p672_p5 = por %p671_p3, %p670_p1 }
  0x3a   : > { %p668_p13 = pneg %p667_p10 }
  0x3b   : > { %p674_p7 = por %p673_p6, %p672_p5 }
  0x3d   : > { %p675_p9 = pnand %p674_p7, %p668_p13 }
  0x3f   : > { %678 = shalt.err (!%p675_p9)
}
  0x40   : > { %s679_s26 = scalar_lea.vmem %s935_s30, 3072  ;;  %s786_s29 = smov [#allocation6]  }
  0x41   : > { %p680_p11 = scmp.ne.s32.totalorder %s935_s30, %s679_s26  ;;  %s684_s6 = sshll.u32 %s786_s29, 4  ;;  %s685_s6 = int_to_ptr.vmem [resolvable:$false] %s684_s6 }
  0x42   : > { %s686_s4 = scalar_lea.vmem %s685_s6, 6144  ;;  %p687_p8 = scmp.lt.s32.totalorder %s935_s30, %s685_s6 }
  0x43   : > { %p682_p4 = pnand %p680_p11, %p636_p2  ;;  %p688_p1 = scmp.lt.s32.totalorder %s686_s4, %s679_s26 }
  0x45   : > { %p683_p10 = pneg %p682_p4  ;;  %p689_p3 = por %p688_p1, %p687_p8 }
  0x47   : > { %p690_p5 = pnand %p689_p3, %p683_p10 }
  0x49   : > { %693 = shalt.err (!%p690_p5)
}
  0x4a   : > { %572 = dma.hbm_to_vmem [thread:$0]  (!%p874_p0), %s931_s20, 3072, %s935_s30, %s155_s3, %s783_s7, %s784_s8, %s785_s15  }
  0x4b   : > { %177 = sbr.rel (%p922_p12) target bundleno = 165 (0xa5), region = 28  ;;  %s969_s5 = sand.u32 (!%p922_p12), 1, %s764_s10  }
  0x4c   : > { %s559_s27 = smul.u32 (!%p922_p12), 192, %s969_s5  ;;  %s180_s18 = scalar_lea.sflag (!%p922_p12), [#allocation4], %s969_s5 }
  0x4d   : > { %p1188_p8 = scmp.ne.s32.totalorder (!%p922_p12), %s1183_s21, 0 }
  0x4e   : > { %s973_s28 = scalar_lea.vmem (!%p922_p12), [#allocation3], %s559_s27 }
  0x52   : > { %747 = dma.done.wait (%p1188_p8), %s180_s18, 3072  }
  0x53   : > { %749 = vsyncadd (%p1188_p8), %s180_s18, 4294964224  ;;  %s189_s25 = scalar_lea.sflag [#allocation7], %s969_s5  ;;  %s980_s7 = scalar_lea.vmem [#allocation6], %s559_s27 }
  0x54   : > { %751 = dma.done.wait (%p1188_p8), %s189_s25, 3072  }
  0x55   : > { %753 = vsyncadd (%p1188_p8), %s189_s25, 4294964224  ;;  %v987_v0 = vld [vmem:[%s973_s28] sm:$0xff]  ;;  %v990_v1 = vld [vmem:[%s973_s28 + $0x10] sm:$0xff]  ;;  %s552_s21 = sshll.u32 %s969_s5, 3  ;;  %s554_s8 = sshll.u32 %s772_s12, 7 }
  0x56   : > { %v993_v2 = vld [vmem:[%s973_s28 + $0x8] sm:$0xff]  ;;  %v996_v3 = vld [vmem:[%s973_s28 + $0x18] sm:$0xff]  ;;  %v1005_v6 = vld [vmem:[%s973_s28 + $0x30] sm:$0xff]  ;;  %v332_v8 = vmul.f32 0.071428575, %v987_v0  ;;  %v334_v9 = vmul.f32 0.5, %v990_v1  ;;  %s1128_s3 = scalar_lea.hbm %s1179_s2, %s554_s8 }
  0x57   : > { %v999_v4 = vld [vmem:[%s973_s28 + $0x28] sm:$0xff]  ;;  %v1002_v5 = vld [vmem:[%s973_s28 + $0x38] sm:$0xff]  ;;  %v1008_v7 = vld [vmem:[%s973_s28 + $0x40] sm:$0xff]  ;;  %v333_v10 = vmul.f32 0.071428575, %v993_v2  ;;  %v336_v11 = vmul.f32 0.5, %v996_v3 }
  0x58   : > { %v358_v12 = vmul.f32 0.071428575, %v999_v4  ;;  %v360_v13 = vmul.f32 0.5, %v1002_v5  ;;  %v359_v14 = vmul.f32 0.071428575, %v1005_v6  ;;  %v362_v15 = vmul.f32 0.5, %v1008_v7 }
  0x59   : > { %v235_v16 = vld [vmem:[%s973_s28 + $0x50] sm:$0xff]  ;;  %v236_v17 = vld [vmem:[%s973_s28 + $0x58] sm:$0xff]  ;;  %v1021_v18 = vld [vmem:[%s980_s7] sm:$0xff]  ;;  %v1023_v19 = vsub.f32 %v332_v8, %v334_v9  ;;  %v1025_v20 = vadd.f32 %v334_v9, %v332_v8  ;;  %v1036_v24 = vsub.f32 %v333_v10, %v336_v11  ;;  %v339_v28 = vadd.f32 %v336_v11, %v333_v10  ;;  %s217_s15 = scalar_lea.vmem [#allocation8], %s552_s21  ;;  %s429_s19 = scalar_lea.sflag [#allocation5], %s969_s5 }
  0x5a   : > { %v1028_v21 = vld [vmem:[%s980_s7 + $0x8] sm:$0xff]  ;;  %v1031_v22 = vld [vmem:[%s980_s7 + $0x10] sm:$0xff]  ;;  %v1034_v23 = vld [vmem:[%s980_s7 + $0x18] sm:$0xff]  ;;  %v361_v30 = vsub.f32 %v358_v12, %v360_v13  ;;  %v364_v31 = vadd.f32 %v360_v13, %v358_v12  ;;  %v321_v36 = vmul.f32 0.071428575, %v1021_v18  ;;  %v363_v37 = vsub.f32 %v359_v14, %v362_v15  ;;  %s442_s16 = sshll.u32 %s217_s15, 4  ;;  %s1130_s16 = int_to_ptr.vmem [resolvable:$true] %s442_s16 }
  0x5b   : > { %v237_v25 = vld [vmem:[%s973_s28 + $0x60] sm:$0xff]  ;;  %v259_v26 = vld [vmem:[%s980_s7 + $0x50] sm:$0xff]  ;;  %v260_v27 = vld [vmem:[%s980_s7 + $0x58] sm:$0xff]  ;;  %v349_v29 = vsub.f32 %v1025_v20, %v1023_v19  ;;  %v365_v38 = vadd.f32 %v362_v15, %v359_v14  ;;  %v322_v42 = vmul.f32 0.071428575, %v1028_v21  ;;  %v323_v43 = vmul.f32 0.5, %v1031_v22 }
  0x5c   : > { %v238_v32 = vld [vmem:[%s973_s28 + $0x68] sm:$0xff]  ;;  %v261_v33 = vld [vmem:[%s980_s7 + $0x60] sm:$0xff]  ;;  %v280_v35 = vsub.f32 %v235_v16, %v259_v26  ;;  %v239_v39 = vld [vmem:[%s973_s28 + $0x70] sm:$0xff]  ;;  %v281_v41 = vsub.f32 %v236_v17, %v260_v27  ;;  %v325_v44 = vmul.f32 0.5, %v1034_v23  ;;  %v350_v46 = vsub.f32 %v339_v28, %v1036_v24  ;;  %s694_s26 = scalar_lea.vmem %s1130_s16, 128  ;;  %p1191_p2 = scmp.ne.s32.totalorder %s1184_s22, 0 }
  0x5d   : > { %v262_v34 = vld [vmem:[%s980_s7 + $0x68] sm:$0xff]  ;;  %v263_v40 = vld [vmem:[%s980_s7 + $0x70] sm:$0xff]  ;;  %v282_v45 = vsub.f32 %v237_v25, %v261_v33  ;;  %v375_v47 = vsub.f32 %v364_v31, %v361_v30  ;;  %v376_v48 = vsub.f32 %v365_v38, %v363_v37  ;;  %v240_v49 = vld [vmem:[%s973_s28 + $0x78] sm:$0xff]  ;;  %v324_v59 = vsub.f32 %v321_v36, %v323_v43  ;;  %p695_p0 = scmp.ne.s32.totalorder %s1130_s16, %s694_s26  ;;  %s787_s12 = smov [#allocation8]  }
  0x5e   : > { %v241_v50 = vld [vmem:[%s973_s28 + $0x80] sm:$0xff]  ;;  %v242_v51 = vld [vmem:[%s973_s28 + $0x88] sm:$0xff]  ;;  %v283_v52 = vsub.f32 %v238_v32, %v262_v34  ;;  %v264_v53 = vld [vmem:[%s980_s7 + $0x78] sm:$0xff]  ;;  %v284_v56 = vsub.f32 %v239_v39, %v263_v40  ;;  %v294_v57 = vmul.f32 %v280_v35, %v280_v35  ;;  %v295_v58 = vmul.f32 %v281_v41, %v281_v41  ;;  %s698_s29 = sshll.u32 %s787_s12, 4  ;;  %s699_s29 = int_to_ptr.vmem [resolvable:$false] %s698_s29 }
  0x5f   : > { %v265_v54 = vld [vmem:[%s980_s7 + $0x80] sm:$0xff]  ;;  %v266_v55 = vld [vmem:[%s980_s7 + $0x88] sm:$0xff]  ;;  %v326_v60 = vsub.f32 %v322_v42, %v325_v44  ;;  %v327_v61 = vadd.f32 %v323_v43, %v321_v36  ;;  %v296_v62 = vmul.f32 %v282_v45, %v282_v45  ;;  %v351_v63 = vmul.f32 %v350_v46, %v349_v29  ;;  %p696_p12 = pnand %p695_p0, %p1191_p2  ;;  %s700_s6 = scalar_lea.vmem %s699_s29, 256 }
  0x60   : > { %v377_v8 = vmul.f32 %v376_v48, %v375_v47  ;;  %v285_v9 = vsub.f32 %v240_v49, %v264_v53  ;;  %v286_v10 = vsub.f32 %v241_v50, %v265_v54  ;;  %v287_v11 = vsub.f32 %v242_v51, %v266_v55  ;;  %v268_v53 = vld [vmem:[%s980_s7 + $0x98] sm:$0xff]  ;;  %p701_p6 = scmp.lt.s32.totalorder %s1130_s16, %s699_s29  ;;  %p702_p7 = scmp.lt.s32.totalorder %s700_s6, %s694_s26 }
  0x61   : > { %v297_v12 = vmul.f32 %v283_v52, %v283_v52  ;;  %v298_v13 = vmul.f32 %v284_v56, %v284_v56  ;;  %v308_v14 = vadd.f32 %v295_v58, %v294_v57  ;;  %v328_v15 = vadd.f32 %v325_v44, %v322_v42  ;;  %v244_v52 = vld [vmem:[%s973_s28 + $0x98] sm:$0xff]  ;;  %p697_p13 = pneg %p696_p12 }
  0x62   : > { %v329_v16 = vsub.f32 %v327_v61, %v324_v59  ;;  %v340_v17 = vmin.f32 %v1025_v20, %v327_v61  ;;  %v341_v25 = vmax.f32 %v1023_v19, %v324_v59  ;;  %v345_v26 = vmax.f32 %v1036_v24, %v326_v60  ;;  %v243_v20 = vld [vmem:[%s973_s28 + $0x90] sm:$0xff]  ;;  %p703_p9 = por %p702_p7, %p701_p6 }
  0x63   : > { %v366_v27 = vmin.f32 %v364_v31, %v327_v61  ;;  %v309_v32 = vadd.f32 %v308_v14, %v296_v62  ;;  %v330_v29 = vsub.f32 %v328_v15, %v326_v60  ;;  %v344_v33 = vmin.f32 %v339_v28, %v328_v15  ;;  %v267_v19 = vld [vmem:[%s980_s7 + $0x90] sm:$0xff]  ;;  %v245_v61 = vld [vmem:[%s973_s28 + $0xa0] sm:$0xff] }
  0x64   : > { %v367_v34 = vmax.f32 %v361_v30, %v324_v59  ;;  %v299_v35 = vmul.f32 %v285_v9, %v285_v9  ;;  %v342_v36 = vsub.f32 %v340_v17, %v341_v25  ;;  %v370_v39 = vmin.f32 %v365_v38, %v328_v15  ;;  %v269_v62 = vld [vmem:[%s980_s7 + $0xa0] sm:$0xff]  ;;  %v247_v17 = vld [vmem:[%s973_s28 + $0xb0] sm:$0xff]  ;;  %p704_p11 = pnand %p703_p9, %p697_p13 }
  0x65   : > { %v371_v40 = vmax.f32 %v363_v37, %v326_v60  ;;  %v310_v41 = vadd.f32 %v309_v32, %v297_v12  ;;  %v331_v42 = vmul.f32 %v330_v29, %v329_v16  ;;  %v346_v43 = vsub.f32 %v344_v33, %v345_v26  ;;  %v246_v12 = vld [vmem:[%s973_s28 + $0xa8] sm:$0xff]  ;;  %v271_v25 = vld [vmem:[%s980_s7 + $0xb0] sm:$0xff]  ;;  %v248_v26 = vld [vmem:[%s973_s28 + $0xb8] sm:$0xff] }
  0x66   : > { %v368_v44 = vsub.f32 %v366_v27, %v367_v34  ;;  %v300_v45 = vmul.f32 %v286_v10, %v286_v10  ;;  %v343_v46 = vmax.f32 %v342_v36, 0.0  ;;  %v288_v37 = vsub.f32 %v243_v20, %v267_v19  ;;  %v1074_v32 = vld [vmem:[%s980_s7 + $0x20] sm:$0xff]  ;;  %v258_v29 = vld [vmem:[%s980_s7 + $0x48] sm:$0xff]  ;;  %v272_v33 = vld [vmem:[%s980_s7 + $0xb8] sm:$0xff] }
  0x67   : > { %v372_v24 = vsub.f32 %v370_v39, %v371_v40  ;;  %v311_v31 = vadd.f32 %v310_v41, %v298_v13  ;;  %v347_v47 = vmax.f32 %v346_v43, 0.0  ;;  %v352_v48 = vadd.f32 %v351_v63, %v331_v42  ;;  %v270_v13 = vld [vmem:[%s980_s7 + $0xa8] sm:$0xff]  ;;  %v229_v41 = vld [vmem:[%s973_s28 + $0x20] sm:$0xff]  ;;  %v255_v20 = vld [vmem:[%s980_s7 + $0x30] sm:$0xff] }
  0x68   : > { %v369_v28 = vmax.f32 %v368_v44, 0.0  ;;  %v378_v49 = vadd.f32 %v377_v8, %v331_v42  ;;  %v301_v38 = vmul.f32 %v287_v11, %v287_v11  ;;  %v289_v58 = vsub.f32 %v244_v52, %v268_v53  ;;  %v234_v42 = vld [vmem:[%s973_s28 + $0x48] sm:$0xff]  ;;  %v256_v19 = vld [vmem:[%s980_s7 + $0x38] sm:$0xff] }
  0x69   : > { %v373_v30 = vmax.f32 %v372_v24, 0.0  ;;  %v312_v50 = vadd.f32 %v311_v31, %v299_v35  ;;  %v348_v51 = vmul.f32 %v347_v47, %v343_v46  ;;  %v302_v59 = vmul.f32 %v288_v37, %v288_v37  ;;  %v254_v44 = vld [vmem:[%s980_s7 + $0x28] sm:$0xff]  ;;  %v257_v31 = vld [vmem:[%s980_s7 + $0x40] sm:$0xff] }
  0x6a   : > { %v290_v9 = vsub.f32 %v245_v61, %v269_v62  ;;  %v303_v10 = vmul.f32 %v289_v58, %v289_v58  ;;  %v291_v14 = vsub.f32 %v246_v12, %v270_v13  ;;  %v292_v34 = vsub.f32 %v247_v17, %v271_v25 }
  0x6b   : > { %v374_v54 = vmul.f32 %v373_v30, %v369_v28  ;;  %v313_v55 = vadd.f32 %v312_v50, %v300_v45  ;;  %v353_v56 = vsub.f32 %v352_v48, %v348_v51  ;;  %v275_v45 = vsub.f32 %v229_v41, %v1074_v32 }
  0x6c   : > { %v304_v15 = vmul.f32 %v290_v9, %v290_v9  ;;  %v305_v35 = vmul.f32 %v291_v14, %v291_v14  ;;  %v277_v46 = vsub.f32 %v234_v42, %v258_v29  ;;  %v293_v24 = vsub.f32 %v248_v26, %v272_v33 }
  0x6d   : > { %v379_v57 = vsub.f32 %v378_v49, %v374_v54  ;;  %v314_v60 = vadd.f32 %v313_v55, %v301_v38  ;;  %vm354_vm0 = vcmp.ne.f32.partialorder %v353_v56, 0.0  ;;  %v306_v47 = vmul.f32 %v292_v34, %v292_v34 }
  0x6e   : > { %v355_v63 = vsel %vm354_vm0, %v353_v56, 1.0  ;;  %v276_v53 = vmul.f32 %v275_v45, %v275_v45  ;;  %vm274_vm3 = vcmp.eq.f32.partialorder %v1074_v32, 0.0  ;;  %vm273_vm4 = vcmp.gt.f32.partialorder %v1074_v32, 0.0 }
  0x6f   : > { %vm380_vm1 = vcmp.ne.f32.partialorder %v379_v57, 0.0  ;;  %630 = vrcp.f32 %v355_v63  ;;  %v315_v11 = vadd.f32 %v314_v60, %v302_v59 }
  0x70   : > { %v381_v8 = vsel %vm380_vm1, %v379_v57, 1.0 }
  0x71   : > { %632 = vrcp.f32 %v381_v8  ;;  %v316_v16 = vadd.f32 %v315_v11, %v303_v10 }
  0x73   : > { %v317_v36 = vadd.f32 %v316_v16, %v304_v15 }
  0x75   : > { %v318_v48 = vadd.f32 %v317_v36, %v305_v35 }
  0x77   : > { %v319_v56 = vadd.f32 %v318_v48, %v306_v47 }
  0x79   : > { %v631_v27 = vpop.eup %630 }
  0x7a   : > { %v357_v40 = vmul.f32 %v631_v27, %v348_v51 }
  0x7b   : > { %v633_v39 = vpop.eup %632 }
  0x7c   : > { %v383_v43 = vmul.f32 %v633_v39, %v374_v54  ;;  %v278_v54 = vmul.f32 %v277_v46, %v277_v46 }
  0x7e   : > { %vm1085_vm2 = vcmp.gt.f32.partialorder %v383_v43, %v357_v40  ;;  %v385_v30 = vmax.f32 %v357_v40, %v383_v43  ;;  %v279_v61 = vadd.f32 %v278_v54, %v276_v53 }
  0x7f   : > { %v386_v49 = vsel %vm1085_vm2, %v999_v4, %v987_v0  ;;  %v387_v37 = vsel %vm1085_vm2, %v1005_v6, %v993_v2  ;;  %v388_v38 = vsel %vm1085_vm2, %v1002_v5, %v990_v1  ;;  %v389_v50 = vsel %vm1085_vm2, %v1008_v7, %v996_v3 }
  0x80   : > { %v390_v51 = vsel %vm1085_vm2, %v234_v42, %v229_v41  ;;  %v391_v0 = vsel %vm1085_vm2, %v254_v44, %v1021_v18  ;;  %v392_v2 = vsel %vm1085_vm2, %v255_v20, %v1028_v21  ;;  %v393_v1 = vsel %vm1085_vm2, %v256_v19, %v1031_v22 }
  0x81   : > { %v394_v4 = vsel %vm1085_vm2, %v257_v31, %v1034_v23  ;;  %v398_v3 = vsub.f32 %v386_v49, %v391_v0  ;;  %v396_v5 = vsub.f32 %v390_v51, %v385_v30  ;;  %v400_v6 = vsub.f32 %v387_v37, %v392_v2 }
  0x82   : > { %v403_v7 = vsub.f32 %v388_v38, %v393_v1  ;;  %v405_v52 = vsub.f32 %v389_v50, %v394_v4  ;;  %v307_v18 = vmul.f32 %v293_v24, %v293_v24  ;;  %v395_v63 = vsel %vm1085_vm2, %v229_v41, %v234_v42 }
  0x83   : > { %v399_v55 = vmul.f32 %v398_v3, %v398_v3  ;;  %v401_v21 = vmul.f32 %v400_v6, %v400_v6  ;;  %v397_v59 = vmul.f32 %v396_v5, %v396_v5  ;;  %v408_v10 = vmul.f32 %v395_v63, %v395_v63 }
  0x84   : > { %v404_v57 = vmul.f32 %v403_v7, %v403_v7  ;;  %v406_v58 = vmul.f32 %v405_v52, %v405_v52  ;;  %v320_v23 = vadd.f32 %v319_v56, %v307_v18  ;;  %v416_v12 = vmul.f32 0.5, %v279_v61 }
  0x85   : > { %v402_v22 = vadd.f32 %v401_v21, %v399_v55  ;;  %v412_v9 = vmul.f32 2.0, %v397_v59 }
  0x86   : > { %v407_v60 = vadd.f32 %v406_v58, %v404_v57  ;;  %v417_v15 = vsel %vm274_vm3, %v416_v12, 0.0 }
  0x88   : > { %v409_v62 = vadd.f32 %v407_v60, %v402_v22 }
  0x8a   : > { %v410_v8 = vmul.f32 5.0, %v409_v62 }
  0x8c   : > { %v411_v11 = vadd.f32 %v410_v8, %v320_v23 }
  0x8e   : > { %v413_v13 = vadd.f32 %v412_v9, %v411_v11 }
  0x90   : > { %v414_v14 = vadd.f32 %v413_v13, %v408_v10 }
  0x92   : > { %v415_v16 = vsel %vm273_vm4, %v414_v14, 0.0 }
  0x93   : > { %v418_v17 = vadd.f32 %v417_v15, %v415_v16 }
  0x95   : > { %v426_v25 = vmul.f32 0.5, %v418_v17 }
  0x97   : > { %427 = vst [vmem:[%s217_s15] sm:$0xff] %v426_v25 }
  0x98   : > { %707 = shalt.err (!%p704_p11)
}
  0x99   : > { %s708_s4 = scalar_lea.hbm %s1128_s3, 128  ;;  %s712_s18 = scalar_lea.hbm %s1179_s2, 256 }
  0x9a   : > { %p709_p4 = scmp.ne.s32.totalorder %s1128_s3, %s708_s4  ;;  %p713_p3 = scmp.lt.u32.totalorder %s1128_s3, %s1179_s2 }
  0x9b   : > { %p714_p5 = scmp.lt.u32.totalorder %s712_s18, %s708_s4  ;;  %p716_p0 = scmp.lt.u32.totalorder %s708_s4, %s1128_s3 }
  0x9c   : > { %p710_p10 = pnand %p709_p4, %p1191_p2 }
  0x9d   : > { %p715_p8 = por %p714_p5, %p713_p3 }
  0x9e   : > { %p711_p1 = pneg %p710_p10 }
  0x9f   : > { %p717_p12 = por %p716_p0, %p715_p8 }
  0xa1   : > { %p718_p13 = pnand %p717_p12, %p711_p1 }
  0xa3   : > { %721 = shalt.err (!%p718_p13)
}
  0xa4   : > { %564 = dma.vmem_to_hbm [thread:$0]  (%p1191_p2), %s1130_s16, 128, %s1128_s3, %s429_s19  }
  0xa5 PF: > { %s454_s7 = sand.u32 1, %s760_s9   ;;  %p1192_p6 = scmp.ne.s32.totalorder %s1185_s24, 0 }
  0xa6   : > { %p1193_p7 = scmp.ge.s32.totalorder %s780_s14, 2  ;;  %s455_s21 = scalar_lea.sflag [#allocation5], %s454_s7 }
  0xa8   : > { %p574_p9 = pnand %p1193_p7, %p1192_p6 }
  0xaa   : > { %755 = dma.done.wait (!%p574_p9), %s455_s21, 128  }
  0xab   : > { %757 = vsyncadd (!%p574_p9), %s455_s21, 4294967168  ;;  %s21_s14 = sadd.s32 1, %s780_s14   ;;  %s1194_s9 = smov %s764_s10 }
  0xac   : > { %p18_p11 = scmp.ge.s32.totalorder %s21_s14, 4   ;;  %s1195_s10 = smov %s768_s11 }
  0xad   : > { %s1196_s11 = smov %s859_s23  ;;  %s1197_s12 = smov %s776_s13 }
  0xae   : > { %s1198_s13 = smov %s1200_s17  ;;  %20 = sbr.rel (!%p18_p11) target bundleno = 8 (0x8), region = 94 }
  0xb5   :  { %460 = vsyncpa [#allocation4], 1 }
  0xb6   :  { %462 = vsyncpa [#allocation4 + $0x1], 1 }
  0xb7   :  { %463 = vsyncpa [#allocation7], 1 }
  0xb8   :  { %465 = vsyncpa [#allocation7 + $0x1], 1 }
  0xb9   :  { %466 = vsyncpa [#allocation5], 1 }
  0xba   :  { %468 = vsyncpa [#allocation5 + $0x1], 1 }

</bundles_post_ra>
